<compile_context>
chip_gen: v7x
topology: tpu7x:2x2x1
jax: 0.10.0
libtpu: 0.0.40
codegen_flags: <defaults>
</compile_context>

<pallas_src>
import functools

import jax
import jax.numpy as jnp
from jax.experimental import pallas as pl
from jax.experimental.pallas import tpu as pltpu


def _conv1d_block_kernel(x_ref, w_ref, b_ref, o_ref, *, L, K, pad_l,
                         neg_slope, compute_dtype):
    # x_ref: (1, R, G*Cin)        R = S*L rows: S batch groups stacked on sublanes
    # w_ref: (K*G*Cin, G*Cout)    block-diagonal weights, taps flattened (im2col)
    # b_ref: (1, G*Cout)          lane-packed bias
    # o_ref: (1, R, G*Cout)       lane-dense output slab
    R = x_ref.shape[1]
    CI = x_ref.shape[2]

    x = x_ref[0]                                            # (R, CI)

    # Row position within each length-L group (masks both the 'same' padding
    # halo and the cross-group bleed introduced by the cyclic roll).
    need_mask = any((pad_l - k) != 0 for k in range(K))
    if need_mask:
        pos = jax.lax.broadcasted_iota(jnp.int32, (R, CI), 0) % L

    # Build the K shifted slabs (aligned: roll on the XLU, select on the VPU)
    # and fuse them into one lane-axis im2col LHS -> a single MXU matmul.
    slabs = []
    for k in range(K):
        shift = pad_l - k                      # slab_k[l] = x[l + k - pad_l]
        if shift == 0:
            slab = x
        else:
            rolled = pltpu.roll(x, shift=shift % R, axis=0)
            valid = (pos >= shift) & (pos < L + shift)
            slab = jnp.where(valid, rolled, jnp.zeros_like(rolled))
        slabs.append(slab)
    lhs = jnp.concatenate(slabs, axis=-1) if K > 1 else slabs[0]   # (R, K*CI)

    if lhs.dtype != compute_dtype:
        lhs = lhs.astype(compute_dtype)

    # One MXU matmul over the full K*G*Cin contraction, f32 accumulate.
    acc = jnp.dot(lhs, w_ref[...], preferred_element_type=jnp.float32)
    acc = acc + b_ref[...].astype(jnp.float32)              # bias (broadcast)

    # LeakyReLU in f32 on the VPU (v5e-safe even with bf16 matmul inputs).
    y = jnp.where(acc > 0, acc, neg_slope * acc)
    o_ref[0] = y.astype(o_ref.dtype)


def conv1d_block(x_ncl, weight, bias, *, neg_slope=0.01,
                 use_bf16_matmul=True, lanes=128, max_rows_per_step=512):
    """Conv1dBlock forward.

    x_ncl:  (N, Cin, L) float32, PyTorch NCL layout.
    weight: (Cout, Cin, K) PyTorch Conv1d weight.
    bias:   (Cout,)
    Returns (N, Cout, L).

    lanes: lane-packing target; 128 is optimal everywhere, 256 better matches
           the v6e/v7x MXU tile when you also want deeper contractions.
    """
    N, Cin, L = x_ncl.shape
    Cout, Cin_w, K = weight.shape
    assert Cin_w == Cin

    pad_l = (K - 1) // 2                      # PyTorch 'same' split: (K-1)//2, K//2
    compute_dtype = jnp.bfloat16 if use_bf16_matmul else x_ncl.dtype

    # --- lane packing: G batch elements fill the lane axis -------------------
    G = max(1, lanes // max(Cin, Cout))       # collapses to 1 once channels >= lanes
    NG = -(-N // G)                           # number of lane-packed groups

    # --- sublane stacking: S groups per grid step ----------------------------
    S = max(1, min(NG, max_rows_per_step // max(L, 1)))
    num_steps = -(-NG // S)
    Ntot = num_steps * S * G
    R = S * L

    # --- pack input: (N, Cin, L) -> (num_steps, S*L, G*Cin) ------------------
    xb = x_ncl
    if Ntot != N:
        xb = jnp.pad(xb, ((0, Ntot - N), (0, 0), (0, 0)))
    x_packed = (xb.reshape(num_steps, S, G, Cin, L)
                  .transpose(0, 1, 4, 2, 3)
                  .reshape(num_steps, R, G * Cin))

    # --- block-diagonal weights, taps flattened for im2col: (K*G*Cin, G*Cout)
    w_kio = jnp.transpose(weight, (2, 1, 0))                     # (K, Cin, Cout)
    eye_g = jnp.eye(G, dtype=w_kio.dtype)
    w_bd = (jnp.einsum('gh,kio->kgiho', eye_g, w_kio)
              .reshape(K * G * Cin, G * Cout)
              .astype(compute_dtype))
    b_packed = jnp.tile(bias, G).reshape(1, G * Cout).astype(jnp.float32)

    kernel = functools.partial(
        _conv1d_block_kernel, L=L, K=K, pad_l=pad_l,
        neg_slope=neg_slope, compute_dtype=compute_dtype)

    out_packed = pl.pallas_call(
        kernel,
        out_shape=jax.ShapeDtypeStruct((num_steps, R, G * Cout), x_ncl.dtype),
        grid_spec=pltpu.PrefetchScalarGridSpec(
            num_scalar_prefetch=0,
            grid=(num_steps,),
            in_specs=[
                pl.BlockSpec((1, R, G * Cin), lambda n: (n, 0, 0)),
                # Constant operands (weights / bias): constant index maps.
                pl.BlockSpec((K * G * Cin, G * Cout), lambda n: (0, 0)),
                pl.BlockSpec((1, G * Cout), lambda n: (0, 0)),
            ],
            out_specs=pl.BlockSpec((1, R, G * Cout), lambda n: (n, 0, 0)),
        ),
        compiler_params=pltpu.CompilerParams(
            dimension_semantics=("parallel",)),
    )(x_packed, w_bd, b_packed)

    # --- un-pack: (num_steps, S*L, G*Cout) -> (N, Cout, L) -------------------
    out = (out_packed.reshape(num_steps, S, L, G, Cout)
                     .transpose(0, 1, 3, 4, 2)
                     .reshape(Ntot, Cout, L))
    return out[:N]


def conv1d_block_ref(x_ncl, weight, bias, *, neg_slope=0.01):
    """Pure-JAX reference (PyTorch Conv1d 'same' + LeakyReLU)."""
    K = weight.shape[2]
    pad_l, pad_r = (K - 1) // 2, K // 2
    y = jax.lax.conv_general_dilated(
        x_ncl, weight, window_strides=(1,), padding=[(pad_l, pad_r)],
        dimension_numbers=("NCH", "OIH", "NCH"))
    y = y + bias[None, :, None]
    return jnp.where(y > 0, y, neg_slope * y)


if __name__ == "__main__":
    key = jax.random.PRNGKey(0)
    k_x, k_w, k_b = jax.random.split(key, 3)

    # nin=32, nout=32, kernel_size=3; N=8 -> one lane+sublane-packed grid step.
    N, Cin, Cout, L, K = 8, 32, 32, 16, 3
    x = jax.random.normal(k_x, (N, Cin, L), dtype=jnp.float32)
    bound = 1.0 / (Cin * K) ** 0.5
    weight = jax.random.uniform(k_w, (Cout, Cin, K), jnp.float32, -bound, bound)
    bias = jax.random.uniform(k_b, (Cout,), jnp.float32, -bound, bound)

    ref = conv1d_block_ref(x, weight, bias)

    # f32 matmul path: bit-tight validation.
    out_f32 = jax.block_until_ready(
        conv1d_block(x, weight, bias, use_bf16_matmul=False))
    assert out_f32.shape == (N, Cout, L)
    assert jnp.allclose(out_f32, ref, atol=1e-5, rtol=1e-5)

    # Default bf16-matmul path (v6e/v7x MXU-native, f32 accumulate): loose tol.
    out_bf16 = jax.block_until_ready(conv1d_block(x, weight, bias))
    assert out_bf16.shape == (N, Cout, L)
    assert jnp.allclose(out_bf16, ref, atol=5e-2, rtol=5e-2)

    print("KERNEL_OK")
</pallas_src>

<mosaic_0001>
module attributes {stable_mosaic.version = 11 : i64} {
  func.func @_conv1d_block_kernel(%arg0: i32, %arg1: memref<1x32x128xf32, #tpu.memory_space<vmem>>, %arg2: memref<384x128xf32, #tpu.memory_space<vmem>>, %arg3: memref<1x128xf32, #tpu.memory_space<vmem>>, %arg4: memref<1x32x128xf32, #tpu.memory_space<vmem>>) attributes {dimension_semantics = [#tpu.dimension_semantics<parallel>], iteration_bounds = array<i64: 1>, scalar_prefetch = 0 : i64, scratch_operands = 0 : i64, tpu.core_type = #tpu.core_type<tc>, window_params = [{transform_indices = @transform_0, window_bounds = array<i64: 1, 32, 128>}, {pipeline_mode = #tpu.pipeline_mode<synchronous>, transform_indices = @transform_1, window_bounds = array<i64: 384, 128>}, {pipeline_mode = #tpu.pipeline_mode<synchronous>, transform_indices = @transform_2, window_bounds = array<i64: 1, 128>}, {transform_indices = @transform_3, window_bounds = array<i64: 1, 32, 128>}]} {
    %c0 = arith.constant 0 : index
    %c0_0 = arith.constant 0 : index
    %c0_1 = arith.constant 0 : index
    %0 = vector.load %arg1[%c0, %c0_0, %c0_1] : memref<1x32x128xf32, #tpu.memory_space<vmem>>, vector<1x32x128xf32>
    %1 = vector.shape_cast %0 : vector<1x32x128xf32> to vector<32x128xf32>
    %2 = tpu.iota {dimensions = array<i32: 0>} : vector<32x128xi32>
    %c16_i32 = arith.constant 16 : i32
    %c0_i32 = arith.constant 0 : i32
    %3 = arith.cmpi eq, %c16_i32, %c0_i32 : i32
    %c1_i32 = arith.constant 1 : i32
    %4 = arith.select %3, %c1_i32, %c16_i32 : i32
    %5 = vector.broadcast %4 : i32 to vector<32x128xi32>
    %6 = arith.remsi %2, %5 : vector<32x128xi32>
    %c0_i32_2 = arith.constant 0 : i32
    %7 = vector.broadcast %c0_i32_2 : i32 to vector<32x128xi32>
    %8 = arith.cmpi ne, %6, %7 : vector<32x128xi32>
    %c0_i32_3 = arith.constant 0 : i32
    %9 = vector.broadcast %c0_i32_3 : i32 to vector<32x128xi32>
    %10 = arith.cmpi slt, %6, %9 : vector<32x128xi32>
    %c0_i32_4 = arith.constant 0 : i32
    %11 = arith.cmpi slt, %4, %c0_i32_4 : i32
    %12 = vector.broadcast %11 : i1 to vector<32x128xi1>
    %13 = vector.broadcast %12 : vector<32x128xi1> to vector<32x128xi1>
    %14 = arith.xori %10, %13 : vector<32x128xi1>
    %15 = arith.andi %14, %8 : vector<32x128xi1>
    %16 = vector.broadcast %4 : i32 to vector<32x128xi32>
    %17 = arith.addi %6, %16 : vector<32x128xi32>
    %18 = arith.select %15, %17, %6 : vector<32x128xi1>, vector<32x128xi32>
    %c1_i32_5 = arith.constant 1 : i32
    %19 = tpu.dynamic_rotate %1 by %c1_i32_5 dim 0 : vector<32x128xf32>, i32 -> vector<32x128xf32>
    %c1_i32_6 = arith.constant 1 : i32
    %20 = vector.broadcast %c1_i32_6 : i32 to vector<32x128xi32>
    %21 = arith.cmpi sge, %18, %20 : vector<32x128xi32>
    %c17_i32 = arith.constant 17 : i32
    %22 = vector.broadcast %c17_i32 : i32 to vector<32x128xi32>
    %23 = arith.cmpi slt, %18, %22 : vector<32x128xi32>
    %24 = arith.andi %21, %23 : vector<32x128xi1>
    %cst = arith.constant 0.000000e+00 : f32
    %25 = vector.broadcast %cst : f32 to vector<32x128xf32>
    %26 = arith.select %24, %19, %25 : vector<32x128xi1>, vector<32x128xf32>
    %c31_i32 = arith.constant 31 : i32
    %27 = tpu.dynamic_rotate %1 by %c31_i32 dim 0 : vector<32x128xf32>, i32 -> vector<32x128xf32>
    %c-1_i32 = arith.constant -1 : i32
    %28 = vector.broadcast %c-1_i32 : i32 to vector<32x128xi32>
    %29 = arith.cmpi sge, %18, %28 : vector<32x128xi32>
    %c15_i32 = arith.constant 15 : i32
    %30 = vector.broadcast %c15_i32 : i32 to vector<32x128xi32>
    %31 = arith.cmpi slt, %18, %30 : vector<32x128xi32>
    %32 = arith.andi %29, %31 : vector<32x128xi1>
    %cst_7 = arith.constant 0.000000e+00 : f32
    %33 = vector.broadcast %cst_7 : f32 to vector<32x128xf32>
    %34 = arith.select %32, %27, %33 : vector<32x128xi1>, vector<32x128xf32>
    %35 = tpu.concatenate %26, %1, %34 in 1 : vector<32x128xf32>, vector<32x128xf32>, vector<32x128xf32> -> vector<32x384xf32>
    %c0_8 = arith.constant 0 : index
    %c0_9 = arith.constant 0 : index
    %36 = vector.load %arg2[%c0_8, %c0_9] : memref<384x128xf32, #tpu.memory_space<vmem>>, vector<384x128xf32>
    %cst_10 = arith.constant dense<0.000000e+00> : vector<32x128xf32>
    %37 = tpu.matmul %35, %36, %cst_10 {dimension_numbers = #tpu.dot_dimension_numbers<[1], [0], [0], [1], [0, 0, 1, 1], [], []>} : vector<32x384xf32>, vector<384x128xf32>, vector<32x128xf32> -> vector<32x128xf32>
    %c0_11 = arith.constant 0 : index
    %c0_12 = arith.constant 0 : index
    %38 = vector.load %arg3[%c0_11, %c0_12] : memref<1x128xf32, #tpu.memory_space<vmem>>, vector<1x128xf32>
    %39 = vector.broadcast %38 : vector<1x128xf32> to vector<32x128xf32>
    %40 = arith.addf %37, %39 : vector<32x128xf32>
    %cst_13 = arith.constant 0.000000e+00 : f32
    %41 = vector.broadcast %cst_13 : f32 to vector<32x128xf32>
    %42 = arith.cmpf ogt, %40, %41 : vector<32x128xf32>
    %cst_14 = arith.constant 0.00999999977 : f32
    %43 = vector.broadcast %cst_14 : f32 to vector<32x128xf32>
    %44 = arith.mulf %43, %40 : vector<32x128xf32>
    %45 = arith.select %42, %40, %44 : vector<32x128xi1>, vector<32x128xf32>
    %c0_15 = arith.constant 0 : index
    %c0_16 = arith.constant 0 : index
    %c0_17 = arith.constant 0 : index
    %46 = vector.load %arg4[%c0_15, %c0_16, %c0_17] : memref<1x32x128xf32, #tpu.memory_space<vmem>>, vector<1x32x128xf32>
    %47 = vector.shape_cast %46 : vector<1x32x128xf32> to vector<32x128xf32>
    %48 = vector.shape_cast %45 : vector<32x128xf32> to vector<1x32x128xf32>
    tpu.vector_store %arg4[%c0_15, %c0_16, %c0_17], %48 {strides = array<i32>} : memref<1x32x128xf32, #tpu.memory_space<vmem>>, vector<1x32x128xf32>,
    return
  }
  func.func @transform_0(%arg0: i32) -> (i32, i32, i32) {
    %c0_i32 = arith.constant 0 : i32
    %c0_i32_0 = arith.constant 0 : i32
    %c0_i32_1 = arith.constant 0 : i32
    return %arg0, %c0_i32, %c0_i32_0 : i32, i32, i32
  }
  func.func @transform_1(%arg0: i32) -> (i32, i32) {
    %c0_i32 = arith.constant 0 : i32
    %c0_i32_0 = arith.constant 0 : i32
    %c0_i32_1 = arith.constant 0 : i32
    return %c0_i32, %c0_i32_0 : i32, i32
  }
  func.func @transform_2(%arg0: i32) -> (i32, i32) {
    %c0_i32 = arith.constant 0 : i32
    %c0_i32_0 = arith.constant 0 : i32
    %c0_i32_1 = arith.constant 0 : i32
    return %c0_i32, %c0_i32_0 : i32, i32
  }
  func.func @transform_3(%arg0: i32) -> (i32, i32, i32) {
    %c0_i32 = arith.constant 0 : i32
    %c0_i32_0 = arith.constant 0 : i32
    %c0_i32_1 = arith.constant 0 : i32
    return %arg0, %c0_i32, %c0_i32_0 : i32, i32, i32
  }
}

</mosaic_0001>

<bundles_post_ra>
// kernel: tpu_custom_call.1
= control target key start
LH: loop header
LB: loop body
LE: loop exit
PB: predicated region body
PF: predicated region fallthrough
CT: control target
= control target key end

     0   :  { %8 = vsyncpa [#allocation3], 0  ;;  %s768_s0 = inlined_call_operand.hbm [shape: f32[1,32,128], index: 0, kind: input, shape index: {}]   ;;  %s769_s1 = inlined_call_operand.hbm [shape: f32[384,128], index: 1, kind: input, shape index: {}]   ;;  %s770_s2 = inlined_call_operand.vmem [shape: f32[1,128], index: 2, kind: input, shape index: {}]   ;;  %s771_s3 = inlined_call_operand.hbm [shape: f32[1,32,128], index: 3, kind: output, shape index: {}]  }
   0x1   :  { %9 = vsyncpa [#allocation6], 0 }
   0x2   :  { %10 = vsyncpa [#allocation4], 0  ;;  %s657_s12 = smov [#allocation2]   ;;  %s585_s16 = scalar_lea.hbm %s768_s0, 512 }
   0x3   :  { %s16_s13 = sshll.u32 %s657_s12, 4  ;;  %p586_p0 = scmp.ne.s32.totalorder %s768_s0, %s585_s16  ;;  %s17_s13 = int_to_ptr.vmem [resolvable:$true] %s16_s13 }
   0x4   :  { %p589_p1 = scmp.lt.u32.totalorder %s585_s16, %s768_s0 }
   0x6   :  { %p591_p2 = pnand %p589_p1, %p586_p0 }
   0x8   :  { %594 = shalt.err (!%p591_p2)
}
   0x9   :  { %s595_s21 = scalar_lea.vmem %s17_s13, 512  ;;  %p600_p4 = scmp.lt.s32.totalorder %s17_s13, %s17_s13 }
   0xa   :  { %p596_p3 = scmp.ne.s32.totalorder %s17_s13, %s595_s21  ;;  %p601_p5 = scmp.lt.s32.totalorder %s595_s21, %s595_s21 }
   0xc   :  { %p602_p6 = por %p601_p5, %p600_p4 }
   0xe   :  { %p603_p7 = pnand %p602_p6, %p596_p3 }
  0x10   :  { %606 = shalt.err (!%p603_p7)
}
  0x11   :  { %s658_s22 = smov 128   ;;  %s659_s23 = smov 8  }
  0x12   :  { %22 = dma.hbm_to_vmem [thread:$0]  %s768_s0, 512, %s17_s13, [#allocation3], %s658_s22, %s658_s22, %s659_s23  }
  0x13   :  { %s660_s26 = smov [#allocation5]   ;;  %s607_s30 = scalar_lea.hbm %s769_s1, 6144 }
  0x14   :  { %s28_s27 = sshll.u32 %s660_s26, 4  ;;  %p608_p8 = scmp.ne.s32.totalorder %s769_s1, %s607_s30  ;;  %s29_s27 = int_to_ptr.vmem [resolvable:$true] %s28_s27 }
  0x15   :  { %p611_p9 = scmp.lt.u32.totalorder %s607_s30, %s769_s1 }
  0x17   :  { %p613_p10 = pnand %p611_p9, %p608_p8 }
  0x19   :  { %616 = shalt.err (!%p613_p10)
}
  0x1a   :  { %s617_s8 = scalar_lea.vmem %s29_s27, 6144  ;;  %p622_p12 = scmp.lt.s32.totalorder %s29_s27, %s29_s27 }
  0x1b   :  { %p618_p11 = scmp.ne.s32.totalorder %s29_s27, %s617_s8  ;;  %p623_p13 = scmp.lt.s32.totalorder %s617_s8, %s617_s8 }
  0x1d   :  { %p624_p0 = por %p623_p13, %p622_p12 }
  0x1f   :  { %p625_p1 = pnand %p624_p0, %p618_p11 }
  0x21   :  { %628 = shalt.err (!%p625_p1)
}
  0x22   :  { %34 = dma.hbm_to_vmem [thread:$0]  %s769_s1, 6144, %s29_s27, [#allocation6], %s658_s22, %s658_s22, %s659_s23  }
  0x23   :  { %651 = dma.done.wait [#allocation3], 512  }
  0x24   :  { %652 = vsyncadd [#allocation3], 4294966784 }
  0x25   :  { %653 = dma.done.wait [#allocation6], 6144  }
  0x26   :  { %654 = vsyncadd [#allocation6], 4294961152  ;;  %v166_v0 = vld [vmem:[#allocation5 + $0x80] sm:$0xff]  ;;  %v167_v1 = vld [vmem:[#allocation5 + $0x88] sm:$0xff]  ;;  %v47_v36 = vlaneseq }
  0x27   :  { %v150_v2 = vld [vmem:[#allocation5] sm:$0xff]  ;;  %v516_v3 = vpack.c.bf16 %v167_v1, %v166_v0  ;;  %v151_v4 = vld [vmem:[#allocation5 + $0x8] sm:$0xff]  ;;  %v168_v5 = vld [vmem:[#allocation5 + $0x90] sm:$0xff] }
  0x28   :  { %v169_v6 = vld [vmem:[#allocation5 + $0x98] sm:$0xff]  ;;  %v518_v7 = vpack.c.bf16 %v151_v4, %v150_v2  ;;  %v182_v9 = vld [vmem:[#allocation5 + $0x100] sm:$0xff]  ;;  %v183_v10 = vld [vmem:[#allocation5 + $0x108] sm:$0xff]  ;;  %v712_v46 = vshrl.u32 %v47_v36, 7 }
  0x29   :  { %v520_v8 = vpack.c.bf16 %v169_v6, %v168_v5  ;;  %v152_v11 = vld [vmem:[#allocation5 + $0x10] sm:$0xff]  ;;  %517 = vmatprep.subr.bf16.mxu0 %v516_v3  ;;  %v548_v12 = vpack.c.bf16 %v183_v10, %v182_v9  ;;  %v153_v13 = vld [vmem:[#allocation5 + $0x18] sm:$0xff]  ;;  %v170_v14 = vld [vmem:[#allocation5 + $0xa0] sm:$0xff] }
  0x2a   :  { %v171_v15 = vld [vmem:[#allocation5 + $0xa8] sm:$0xff]  ;;  %519 = vmatpush3.bf16.msra.mxu0 %v518_v7  ;;  %v522_v16 = vpack.c.bf16 %v153_v13, %v152_v11  ;;  %v184_v17 = vld [vmem:[#allocation5 + $0x110] sm:$0xff]  ;;  %v185_v18 = vld [vmem:[#allocation5 + $0x118] sm:$0xff]  ;;  %vm129_vm0 = vcmp.lt.s32.totalorder %v712_v46, 7  ;;  %vm104_vm1 = vcmp.lt.s32.totalorder %v712_v46, 1 }
  0x2b   :  { %521 = vmatprep.subr.bf16.mxu0 %v520_v8  ;;  %549 = vmatprep.subr.bf16.mxu1 %v548_v12  ;;  %v524_v19 = vpack.c.bf16 %v171_v15, %v170_v14  ;;  %v552_v20 = vpack.c.bf16 %v185_v18, %v184_v17  ;;  %v154_v21 = vld [vmem:[#allocation5 + $0x20] sm:$0xff]  ;;  %v155_v22 = vld [vmem:[#allocation5 + $0x28] sm:$0xff]  ;;  %v172_v23 = vld [vmem:[#allocation5 + $0xb0] sm:$0xff]  ;;  %v49_v14 = vadd.s32 8, %v712_v46 }
  0x2c   :  { %551 = vmatpush3.bf16.msra.mxu1 %v548_v12  ;;  %v173_v24 = vld [vmem:[#allocation5 + $0xb8] sm:$0xff]  ;;  %v186_v25 = vld [vmem:[#allocation5 + $0x120] sm:$0xff]  ;;  %v187_v26 = vld [vmem:[#allocation5 + $0x128] sm:$0xff]  ;;  %v526_v28 = vpack.c.bf16 %v155_v22, %v154_v21 }
  0x2d   :  { %553 = vmatprep.subr.bf16.mxu1 %v552_v20  ;;  %v556_v27 = vpack.c.bf16 %v187_v26, %v186_v25  ;;  %v188_v29 = vld [vmem:[#allocation5 + $0x130] sm:$0xff]  ;;  %v189_v30 = vld [vmem:[#allocation5 + $0x138] sm:$0xff]  ;;  %v528_v31 = vpack.c.bf16 %v173_v24, %v172_v23  ;;  %v174_v34 = vld [vmem:[#allocation5 + $0xc0] sm:$0xff]  ;;  %v63_v21 = vand.u32 15, %v49_v14  ;;  %v51_v23 = vadd.s32 24, %v712_v46 }
  0x2e   :  { %523 = vmatpush3.bf16.msra.mxu0 %v522_v16  ;;  %v156_v32 = vld [vmem:[#allocation5 + $0x30] sm:$0xff]  ;;  %v157_v33 = vld [vmem:[#allocation5 + $0x38] sm:$0xff]  ;;  %v175_v35 = vld [vmem:[#allocation5 + $0xc8] sm:$0xff]  ;;  %v560_v37 = vpack.c.bf16 %v189_v30, %v188_v29 }
  0x2f   :  { %525 = vmatprep.subr.bf16.mxu0 %v524_v19  ;;  %v530_v38 = vpack.c.bf16 %v157_v33, %v156_v32  ;;  %v190_v39 = vld [vmem:[#allocation5 + $0x140] sm:$0xff]  ;;  %v191_v40 = vld [vmem:[#allocation5 + $0x148] sm:$0xff]  ;;  %v532_v41 = vpack.c.bf16 %v175_v35, %v174_v34  ;;  %v176_v44 = vld [vmem:[#allocation5 + $0xd0] sm:$0xff]  ;;  %v56_v19 = vand.u32 15, %v712_v46  ;;  %vm139_vm3 = vcmp.lt.s32.totalorder %v63_v21, 15 }
  0x30   :  { %555 = vmatpush3.bf16.msra.mxu1 %v552_v20  ;;  %v158_v42 = vld [vmem:[#allocation5 + $0x40] sm:$0xff]  ;;  %v159_v43 = vld [vmem:[#allocation5 + $0x48] sm:$0xff]  ;;  %v177_v45 = vld [vmem:[#allocation5 + $0xd8] sm:$0xff]  ;;  %v564_v47 = vpack.c.bf16 %v191_v40, %v190_v39  ;;  %v77_v29 = vand.u32 15, %v51_v23 }
  0x31   :  { %557 = vmatprep.subr.bf16.mxu1 %v556_v27  ;;  %v714_v48 = vld [vmem:[#allocation2] sm:$0xff]  ;;  %v534_v49 = vpack.c.bf16 %v159_v43, %v158_v42  ;;  %v192_v50 = vld [vmem:[#allocation5 + $0x150] sm:$0xff]  ;;  %v193_v51 = vld [vmem:[#allocation5 + $0x158] sm:$0xff]  ;;  %v536_v54 = vpack.c.bf16 %v177_v45, %v176_v44  ;;  %vm109_vm2 = vcmp.ge.s32.totalorder %v56_v19, 1 }
  0x32   :  { %527 = vmatpush3.bf16.msra.mxu0 %v526_v28  ;;  %v125_v52 = vrot.slane %v714_v48, 1  ;;  %269 = vmatprep.mubr.f32.mxu0 %v714_v48  ;;  %v718_v53 = vld [vmem:[#allocation2 + $0x8] sm:$0xff]  ;;  %v160_v55 = vld [vmem:[#allocation5 + $0x50] sm:$0xff]  ;;  %v161_v56 = vld [vmem:[#allocation5 + $0x58] sm:$0xff]  ;;  %v568_v60 = vpack.c.bf16 %v193_v51, %v192_v50  ;;  %v100_v18 = vrot.slane %v714_v48, 7  ;;  %vm141_vm4 = vcmp.lt.s32.totalorder %v77_v29, 15 }
  0x33   :  { %529 = vmatprep.subr.bf16.mxu0 %v528_v31  ;;  %v126_v57 = vrot.slane %v718_v53, 1  ;;  %v178_v58 = vld [vmem:[#allocation5 + $0xe0] sm:$0xff]  ;;  %v179_v59 = vld [vmem:[#allocation5 + $0xe8] sm:$0xff]  ;;  %v538_v62 = vpack.c.bf16 %v161_v56, %v160_v55  ;;  %v180_v4 = vld [vmem:[#allocation5 + $0xf0] sm:$0xff]  ;;  %v101_v26 = vrot.slane %v718_v53, 7 }
  0x34   :  { %559 = vmatpush3.bf16.msra.mxu1 %v556_v27  ;;  %v194_v63 = vld [vmem:[#allocation5 + $0x160] sm:$0xff]  ;;  %v195_v0 = vld [vmem:[#allocation5 + $0x168] sm:$0xff]  ;;  %v540_v1 = vpack.c.bf16 %v179_v59, %v178_v58  ;;  %v181_v5 = vld [vmem:[#allocation5 + $0xf8] sm:$0xff]  ;;  %v50_v27 = vadd.s32 16, %v712_v46 }
  0x35   :  { %561 = vmatprep.subr.bf16.mxu1 %v560_v37  ;;  %v132_v61 = vsel %vm129_vm0, %v125_v52, %v126_v57  ;;  %v162_v2 = vld [vmem:[#allocation5 + $0x60] sm:$0xff]  ;;  %v163_v3 = vld [vmem:[#allocation5 + $0x68] sm:$0xff]  ;;  %v572_v6 = vpack.c.bf16 %v195_v0, %v194_v63  ;;  %v196_v8 = vld [vmem:[#allocation5 + $0x170] sm:$0xff]  ;;  %v544_v10 = vpack.c.bf16 %v181_v5, %v180_v4  ;;  %v107_v31 = vsel %vm104_vm1, %v100_v18, %v101_v26 }
  0x36   :  { %531 = vmatpush3.bf16.msra.mxu0 %v530_v38  ;;  %510 = vmatprep.mubr.f32.mxu1 %v132_v61  ;;  %v542_v7 = vpack.c.bf16 %v163_v3, %v162_v2  ;;  %v197_v9 = vld [vmem:[#allocation5 + $0x178] sm:$0xff]  ;;  %v164_v11 = vld [vmem:[#allocation5 + $0x70] sm:$0xff]  ;;  %v70_v32 = vand.u32 15, %v50_v27  ;;  %v409_v39 = vld [vmem:[%s770_s2] ss:$0 sm:$0xff]  ;;  %s661_s2 = smov [#allocation7]  }
  0x37   :  { %533 = vmatprep.subr.bf16.mxu0 %v532_v41  ;;  %v165_v12 = vld [vmem:[#allocation5 + $0x78] sm:$0xff]  ;;  %v576_v15 = vpack.c.bf16 %v197_v9, %v196_v8  ;;  %v45_v16 = vld [vmem:[#allocation2 + $0x10] sm:$0xff]  ;;  %s396_s11 = sshll.u32 %s661_s2, 4  ;;  %s397_s11 = int_to_ptr.vmem [resolvable:$true] %s396_s11 }
  0x38   :  { %563 = vmatpush3.bf16.msra.mxu1 %v560_v37  ;;  %v46_v13 = vld [vmem:[#allocation2 + $0x18] sm:$0xff]  ;;  %v546_v17 = vpack.c.bf16 %v165_v12, %v164_v11  ;;  %v127_v22 = vrot.slane %v45_v16, 1  ;;  %v102_v33 = vrot.slane %v45_v16, 7  ;;  %vm111_vm5 = vcmp.ge.s32.totalorder %v70_v32, 1  ;;  %s629_s12 = scalar_lea.vmem %s397_s11, 512  ;;  %p634_p3 = scmp.lt.s32.totalorder %s397_s11, %s397_s11 }
  0x39   :  { %565 = vmatprep.subr.bf16.mxu1 %v564_v47  ;;  %v103_v20 = vrot.slane %v46_v13, 7  ;;  %v128_v24 = vrot.slane %v46_v13, 1  ;;  %p630_p2 = scmp.ne.s32.totalorder %s397_s11, %s629_s12  ;;  %p635_p4 = scmp.lt.s32.totalorder %s629_s12, %s629_s12 }
  0x3a   :  { %535 = vmatpush3.bf16.msra.mxu0 %v534_v49  ;;  %v131_v28 = vsel %vm129_vm0, %v126_v57, %v127_v22  ;;  %v106_v35 = vsel %vm104_vm1, %v101_v26, %v102_v33 }
  0x3b   :  { %537 = vmatprep.subr.bf16.mxu0 %v536_v54  ;;  %v108_v25 = vsel %vm104_vm1, %v103_v20, %v100_v18  ;;  %v130_v30 = vsel %vm129_vm0, %v127_v22, %v128_v24  ;;  %v133_v34 = vsel %vm129_vm0, %v128_v24, %v125_v52  ;;  %v105_v36 = vsel %vm104_vm1, %v102_v33, %v103_v20  ;;  %p636_p5 = por %p635_p4, %p634_p3 }
  0x3c   :  { %567 = vmatpush3.bf16.msra.mxu1 %v564_v47 }
  0x3d   :  { %569 = vmatprep.subr.bf16.mxu1 %v568_v60  ;;  %p637_p6 = pnand %p636_p5, %p630_p2 }
  0x3e   :  { %539 = vmatpush3.bf16.msra.mxu0 %v538_v62 }
  0x3f   :  { %541 = vmatprep.subr.bf16.mxu0 %v540_v1 }
  0x40   :  { %571 = vmatpush3.bf16.msra.mxu1 %v568_v60 }
  0x41   :  { %573 = vmatprep.subr.bf16.mxu1 %v572_v6 }
  0x42   :  { %543 = vmatpush3.bf16.msra.mxu0 %v542_v7 }
  0x43   :  { %545 = vmatprep.subr.bf16.mxu0 %v544_v10 }
  0x44   :  { %575 = vmatpush3.bf16.msra.mxu1 %v572_v6 }
  0x45   :  { %577 = vmatprep.subr.bf16.mxu1 %v576_v15 }
  0x46   :  { %547 = vmatpush3.bf16.msra.mxu0 %v546_v17 }
  0x48   :  { %579 = vmatpush3.bf16.msra.mxu1 %v576_v15 }
  0x49   :  { %410 = vmatmul.mubr.msk.f32.vlgmr.msra.gmra.mrb[0].mxu0 %vm109_vm2, %v108_v25 }
  0x4a   :  { %274 = vmatprep.mubr.f32.mxu0 %v718_v53 }
  0x4b   :  { %511 = vmatmul.mubr.msk.f32.vlgmr.msra.gmra.mrb[0].mxu1 %vm139_vm3, %v131_v28 }
  0x4c   :  { %513 = vmatprep.mubr.f32.mxu1 %v130_v30 }
  0x4d   :  { %275 = vmatmul.mubr.f32.gmra.mrb[2].mxu0 %v107_v31 }
  0x4e   :  { %279 = vmatprep.mubr.f32.mxu0 %v45_v16 }
  0x4f   :  { %514 = vmatmul.mubr.msk.f32.gmra.mrb[2].mxu1 %vm141_vm4, %v133_v34 }
  0x51   :  { %411 = vmatmul.mubr.msk.f32.gmra.mrb[4].mxu0 %vm111_vm5, %v106_v35 }
  0x52   :  { %284 = vmatprep.mubr.f32.mxu0 %v46_v13 }
  0x55   :  { %285 = vmatmul.mubr.f32.gmra.mrb[6].mxu0 %v105_v36 }
 0x11c   :  { %v446_v37 = vpop.f32.mrb[0].mxu0 }
 0x11d   :  { %v447_v38 = vpop.f32.mrb[1].mxu0 }
 0x11e   :  { %v448_v40 = vadd.f32 %v447_v38, %v446_v37  ;;  %v512_v41 = vpop.f32.mrb[0].mxu1 }
 0x11f   :  { %v356_v42 = vpop.f32.mrb[1].mxu1 }
 0x120   :  { %v449_v43 = vpop.f32.mrb[2].mxu0  ;;  %v272_v44 = vadd.f32 %v448_v40, %v409_v39 }
 0x121   :  { %v450_v45 = vpop.f32.mrb[3].mxu0 }
 0x122   :  { %v451_v47 = vadd.f32 %v450_v45, %v449_v43  ;;  %v357_v48 = vadd.f32 %v356_v42, %v272_v44  ;;  %v515_v49 = vpop.f32.mrb[2].mxu1 }
 0x123   :  { %v366_v50 = vpop.f32.mrb[3].mxu1 }
 0x124   :  { %v277_v51 = vadd.f32 %v451_v47, %v409_v39  ;;  %vm375_vm6 = vcmp.gt.f32.partialorder %v357_v48, 0.0  ;;  %v379_v46 = vmul.f32 0.01, %v357_v48  ;;  %v452_v52 = vpop.f32.mrb[4].mxu0 }
 0x125   :  { %v453_v53 = vpop.f32.mrb[5].mxu0 }
 0x126   :  { %v362_v54 = vadd.f32 %v512_v41, %v277_v51  ;;  %v383_v55 = vsel %vm375_vm6, %v357_v48, %v379_v46  ;;  %v454_v56 = vadd.f32 %v453_v53, %v452_v52 }
 0x127   :  { %387 = vst [vmem:[#allocation7] sm:$0xff] %v383_v55 }
 0x128   :  { %vm376_vm7 = vcmp.gt.f32.partialorder %v362_v54, 0.0  ;;  %v380_v57 = vmul.f32 0.01, %v362_v54  ;;  %v455_v58 = vpop.f32.mrb[6].mxu0  ;;  %v282_v59 = vadd.f32 %v454_v56, %v409_v39 }
 0x129   :  { %v456_v60 = vpop.f32.mrb[7].mxu0 }
 0x12a   :  { %v384_v61 = vsel %vm376_vm7, %v362_v54, %v380_v57  ;;  %v457_v62 = vadd.f32 %v456_v60, %v455_v58  ;;  %v367_v63 = vadd.f32 %v366_v50, %v282_v59 }
 0x12b   :  { %388 = vst [vmem:[#allocation7 + $0x8] sm:$0xff] %v384_v61 }
 0x12c   :  { %v287_v0 = vadd.f32 %v457_v62, %v409_v39  ;;  %vm377_vm8 = vcmp.gt.f32.partialorder %v367_v63, 0.0  ;;  %v381_v1 = vmul.f32 0.01, %v367_v63 }
 0x12e   :  { %v372_v2 = vadd.f32 %v515_v49, %v287_v0  ;;  %v385_v3 = vsel %vm377_vm8, %v367_v63, %v381_v1 }
 0x12f   :  { %389 = vst [vmem:[#allocation7 + $0x10] sm:$0xff] %v385_v3 }
 0x130   :  { %vm378_vm9 = vcmp.gt.f32.partialorder %v372_v2, 0.0  ;;  %v382_v4 = vmul.f32 0.01, %v372_v2 }
 0x132   :  { %v386_v5 = vsel %vm378_vm9, %v372_v2, %v382_v4 }
 0x133   :  { %390 = vst [vmem:[#allocation7 + $0x18] sm:$0xff] %v386_v5 }
 0x134   :  { %640 = shalt.err (!%p637_p6)
}
 0x135   :  { %s641_s15 = scalar_lea.hbm %s771_s3, 512 }
 0x136   :  { %p642_p7 = scmp.ne.s32.totalorder %s771_s3, %s641_s15  ;;  %p645_p8 = scmp.lt.u32.totalorder %s641_s15, %s771_s3 }
 0x138   :  { %p647_p9 = pnand %p645_p8, %p642_p7 }
 0x13a   :  { %650 = shalt.err (!%p647_p9)
}
 0x13b   :  { %402 = dma.vmem_to_hbm [thread:$0]  %s397_s11, 512, %s771_s3, [#allocation4], %s658_s22, %s658_s22, %s659_s23  }
 0x13c   :  { %655 = dma.done.wait [#allocation4], 512  }
 0x13d   :  { %656 = vsyncadd [#allocation4], 4294966784 }
 0x13e   :  { %406 = vsyncpa [#allocation3], 1 }
 0x13f   :  { %407 = vsyncpa [#allocation6], 1 }
 0x140   :  { %408 = vsyncpa [#allocation4], 1 }

</bundles_post_ra>
